<compile_context>
chip_gen: v7x
topology: tpu7x:2x2x1
jax: 0.10.0
libtpu: 0.0.40
codegen_flags: <defaults>
</compile_context>

<pallas_src>
import math
from functools import partial

import numpy as np
import jax
import jax.numpy as jnp
from jax.experimental import pallas as pl
from jax.experimental.pallas import tpu as pltpu


def calc_coeff(iter_num, high=1.0, low=0.0, alpha=10.0, max_iter=10000.0):
    # identical math to the PyTorch helper (only used for grad scaling; forward unaffected)
    return float(2.0 * (high - low) / (1.0 + np.exp(-alpha * iter_num / max_iter))
                 - (high - low) + low)


def _round_up(x, m):
    return (x + m - 1) // m * m


def gvb_adv_kernel(x_ref, w1_ref, b1_ref, w2_ref, b2_ref, wh_ref, bh_ref, out_ref):
    # ad_layer1 + ReLU   (dropout1 = identity in eval mode)
    h1 = jnp.dot(x_ref[...], w1_ref[...], preferred_element_type=jnp.float32)
    h1 = jnp.maximum(h1 + b1_ref[...], 0.0)            # bias-add / ReLU in f32
    # ad_layer2 + ReLU   (dropout2 = identity in eval mode)
    h2 = jnp.dot(h1.astype(w2_ref.dtype), w2_ref[...],
                 preferred_element_type=jnp.float32)
    h2 = jnp.maximum(h2 + b2_ref[...], 0.0)
    # fused heads: [ad_layer3 | gvbd], lane-padded so the store is lane-dense
    out_ref[...] = (jnp.dot(h2.astype(wh_ref.dtype), wh_ref[...],
                            preferred_element_type=jnp.float32)
                    + bh_ref[...]).astype(out_ref.dtype)


def gvb_adversarial_forward(x, params, iteration, *, tile_b=256,
                            compute_dtype=jnp.bfloat16):
    """Forward pass of GVBAdversarialNetwork. Returns (y, z)."""
    _ = calc_coeff(iteration)  # grad_reverse coeff — identity in forward
    # TODO(synk): dropout (p=0.5) is stochastic in train mode; implemented as
    # identity (eval mode) here.
    w1, b1, w2, b2, w3, b3, wd, bd = params
    B, K = x.shape
    H = w1.shape[1]
    multi = w3.shape[1]

    # ---- static padding / packing (host side, constant under jit) ----
    K_pad = _round_up(max(K, 128), 128)          # lane-pad input feature dim
    n_head = 2 * multi
    N_pad = _round_up(max(n_head, 128), 128)     # lane-dense fused-head output
    tile_b = min(tile_b, _round_up(B, 8))        # sublane-aligned batch tile
    B_pad = _round_up(B, tile_b)

    cd = compute_dtype
    if B_pad == B and K_pad == K:
        xp = x.astype(cd)
    else:
        xp = jnp.zeros((B_pad, K_pad), cd).at[:B, :K].set(x.astype(cd))
    if K_pad == K:
        w1p = w1.astype(cd)
    else:
        w1p = jnp.zeros((K_pad, H), cd).at[:K, :].set(w1.astype(cd))
    w2c = w2.astype(cd)
    wh = jnp.zeros((H, N_pad), cd).at[:, :n_head].set(
        jnp.concatenate([w3, wd], axis=1).astype(cd))
    b1f = b1.astype(jnp.float32).reshape(1, H)
    b2f = b2.astype(jnp.float32).reshape(1, H)
    bh = jnp.zeros((1, N_pad), jnp.float32).at[:, :n_head].set(
        jnp.concatenate([b3.reshape(1, -1), bd.reshape(1, -1)], axis=1)
        .astype(jnp.float32))

    grid = (B_pad // tile_b,)
    itemsize = jnp.dtype(cd).itemsize

    # VMEM budget: double-buffered x/out tiles + resident weights + intermediates
    vmem_bytes = (2 * tile_b * K_pad * itemsize
                  + 2 * tile_b * N_pad * 4
                  + (K_pad * H + H * H + H * N_pad) * itemsize
                  + (2 * H + N_pad) * 4
                  + 3 * tile_b * max(H, N_pad) * 4)
    # stay under the smallest physical VMEM (v7x: 64 MiB per TC)
    vmem_limit = min(int(vmem_bytes) * 2 + (1 << 20), 60 << 20)

    flops = 2 * B_pad * (K_pad * H + H * H + H * N_pad)
    bytes_accessed = (B_pad * K_pad * itemsize
                      + (K_pad * H + H * H + H * N_pad) * itemsize
                      + (2 * H + N_pad) * 4
                      + B_pad * N_pad * 4)

    resident = lambda i: (0, 0)   # weights/biases: same block every grid step
    out = pl.pallas_call(
        gvb_adv_kernel,
        out_shape=jax.ShapeDtypeStruct((B_pad, N_pad), jnp.float32),
        grid=grid,
        in_specs=[
            pl.BlockSpec((tile_b, K_pad), lambda i: (i, 0)),   # x tile (streamed)
            pl.BlockSpec((K_pad, H), resident),                # w1
            pl.BlockSpec((1, H), resident),                    # b1
            pl.BlockSpec((H, H), resident),                    # w2
            pl.BlockSpec((1, H), resident),                    # b2
            pl.BlockSpec((H, N_pad), resident),                # fused head weight
            pl.BlockSpec((1, N_pad), resident),                # fused head bias
        ],
        out_specs=pl.BlockSpec((tile_b, N_pad), lambda i: (i, 0)),
        compiler_params=pltpu.CompilerParams(
            dimension_semantics=("parallel",),
            vmem_limit_bytes=vmem_limit),
        cost_estimate=pl.CostEstimate(flops=flops, transcendentals=0,
                                      bytes_accessed=int(bytes_accessed)),
    )(xp, w1p, b1f, w2c, b2f, wh, bh)

    y = out[:B, :multi]
    z = out[:B, multi:n_head]
    return y, z


def init_params(key, in_feature, hidden_size, multi):
    """Deterministic kaiming_normal_ weights (std = sqrt(2 / fan_in)), zero biases.
    Weights are stored already transposed to (in, out)."""
    ks = jax.random.split(key, 4)

    def kaiming(k, fan_in, fan_out):
        std = math.sqrt(2.0 / fan_in)
        # PyTorch weight is (out, in); generate that then transpose to (in, out)
        w = jax.random.normal(k, (fan_out, fan_in), dtype=jnp.float32) * std
        return jnp.transpose(w)

    w1 = kaiming(ks[0], in_feature, hidden_size)
    b1 = jnp.zeros((1, hidden_size), jnp.float32)
    w2 = kaiming(ks[1], hidden_size, hidden_size)
    b2 = jnp.zeros((1, hidden_size), jnp.float32)
    w3 = kaiming(ks[2], hidden_size, multi)
    b3 = jnp.zeros((1, multi), jnp.float32)
    wd = kaiming(ks[3], hidden_size, multi)
    bd = jnp.zeros((1, multi), jnp.float32)
    return (w1, b1, w2, b2, w3, b3, wd, bd)


if __name__ == "__main__":
    key = jax.random.PRNGKey(0)
    k_x, k_p = jax.random.split(key)

    # small shapes consistent with the module (batch large enough to exercise the grid)
    batch, in_feature, hidden_size, multi = 128, 64, 128, 1

    x = jax.random.normal(k_x, (batch, in_feature), dtype=jnp.float32)
    params = init_params(k_p, in_feature, hidden_size, multi)

    fwd = jax.jit(partial(gvb_adversarial_forward, iteration=100, tile_b=64))
    y, z = fwd(x, params)
    jax.block_until_ready((y, z))

    # reference check in plain JAX using the same bf16-dot / f32-accumulate numerics
    w1, b1, w2, b2, w3, b3, wd, bd = params
    cd = jnp.bfloat16
    h1 = jnp.maximum(jnp.dot(x.astype(cd), w1.astype(cd),
                             preferred_element_type=jnp.float32) + b1, 0.0)
    h2 = jnp.maximum(jnp.dot(h1.astype(cd), w2.astype(cd),
                             preferred_element_type=jnp.float32) + b2, 0.0)
    y_ref = jnp.dot(h2.astype(cd), w3.astype(cd),
                    preferred_element_type=jnp.float32) + b3
    z_ref = jnp.dot(h2.astype(cd), wd.astype(cd),
                    preferred_element_type=jnp.float32) + bd

    assert y.shape == (batch, multi) and z.shape == (batch, multi)
    np.testing.assert_allclose(np.asarray(y), np.asarray(y_ref), rtol=2e-2, atol=2e-2)
    np.testing.assert_allclose(np.asarray(z), np.asarray(z_ref), rtol=2e-2, atol=2e-2)

    print("KERNEL_OK")
</pallas_src>

<mosaic_0001>
module attributes {stable_mosaic.version = 11 : i64} {
  func.func @gvb_adv_kernel(%arg0: i32, %arg1: memref<64x128xbf16, #tpu.memory_space<vmem>>, %arg2: memref<128x128xbf16, #tpu.memory_space<vmem>>, %arg3: memref<1x128xf32, #tpu.memory_space<vmem>>, %arg4: memref<128x128xbf16, #tpu.memory_space<vmem>>, %arg5: memref<1x128xf32, #tpu.memory_space<vmem>>, %arg6: memref<128x128xbf16, #tpu.memory_space<vmem>>, %arg7: memref<1x128xf32, #tpu.memory_space<vmem>>, %arg8: memref<64x128xf32, #tpu.memory_space<vmem>>) attributes {dimension_semantics = [#tpu.dimension_semantics<parallel>], iteration_bounds = array<i64: 2>, scalar_prefetch = 0 : i64, scratch_operands = 0 : i64, tpu.core_type = #tpu.core_type<tc>, window_params = [{transform_indices = @transform_0, window_bounds = array<i64: 64, 128>}, {pipeline_mode = #tpu.pipeline_mode<synchronous>, transform_indices = @transform_1, window_bounds = array<i64: 128, 128>}, {pipeline_mode = #tpu.pipeline_mode<synchronous>, transform_indices = @transform_2, window_bounds = array<i64: 1, 128>}, {pipeline_mode = #tpu.pipeline_mode<synchronous>, transform_indices = @transform_3, window_bounds = array<i64: 128, 128>}, {pipeline_mode = #tpu.pipeline_mode<synchronous>, transform_indices = @transform_4, window_bounds = array<i64: 1, 128>}, {pipeline_mode = #tpu.pipeline_mode<synchronous>, transform_indices = @transform_5, window_bounds = array<i64: 128, 128>}, {pipeline_mode = #tpu.pipeline_mode<synchronous>, transform_indices = @transform_6, window_bounds = array<i64: 1, 128>}, {transform_indices = @transform_7, window_bounds = array<i64: 64, 128>}]} {
    %c0 = arith.constant 0 : index
    %c0_0 = arith.constant 0 : index
    %0 = vector.load %arg1[%c0, %c0_0] : memref<64x128xbf16, #tpu.memory_space<vmem>>, vector<64x128xbf16>
    %c0_1 = arith.constant 0 : index
    %c0_2 = arith.constant 0 : index
    %1 = vector.load %arg2[%c0_1, %c0_2] : memref<128x128xbf16, #tpu.memory_space<vmem>>, vector<128x128xbf16>
    %cst = arith.constant dense<0.000000e+00> : vector<64x128xf32>
    %2 = tpu.matmul %0, %1, %cst {dimension_numbers = #tpu.dot_dimension_numbers<[1], [0], [0], [1], [0, 0, 1, 1], [], []>} : vector<64x128xbf16>, vector<128x128xbf16>, vector<64x128xf32> -> vector<64x128xf32>
    %c0_3 = arith.constant 0 : index
    %c0_4 = arith.constant 0 : index
    %3 = vector.load %arg3[%c0_3, %c0_4] : memref<1x128xf32, #tpu.memory_space<vmem>>, vector<1x128xf32>
    %4 = vector.broadcast %3 : vector<1x128xf32> to vector<64x128xf32>
    %5 = arith.addf %2, %4 : vector<64x128xf32>
    %cst_5 = arith.constant 0.000000e+00 : f32
    %6 = vector.broadcast %cst_5 : f32 to vector<64x128xf32>
    %7 = arith.maximumf %5, %6 : vector<64x128xf32>
    %8 = arith.truncf %7 : vector<64x128xf32> to vector<64x128xbf16>
    %c0_6 = arith.constant 0 : index
    %c0_7 = arith.constant 0 : index
    %9 = vector.load %arg4[%c0_6, %c0_7] : memref<128x128xbf16, #tpu.memory_space<vmem>>, vector<128x128xbf16>
    %cst_8 = arith.constant dense<0.000000e+00> : vector<64x128xf32>
    %10 = tpu.matmul %8, %9, %cst_8 {dimension_numbers = #tpu.dot_dimension_numbers<[1], [0], [0], [1], [0, 0, 1, 1], [], []>} : vector<64x128xbf16>, vector<128x128xbf16>, vector<64x128xf32> -> vector<64x128xf32>
    %c0_9 = arith.constant 0 : index
    %c0_10 = arith.constant 0 : index
    %11 = vector.load %arg5[%c0_9, %c0_10] : memref<1x128xf32, #tpu.memory_space<vmem>>, vector<1x128xf32>
    %12 = vector.broadcast %11 : vector<1x128xf32> to vector<64x128xf32>
    %13 = arith.addf %10, %12 : vector<64x128xf32>
    %cst_11 = arith.constant 0.000000e+00 : f32
    %14 = vector.broadcast %cst_11 : f32 to vector<64x128xf32>
    %15 = arith.maximumf %13, %14 : vector<64x128xf32>
    %16 = arith.truncf %15 : vector<64x128xf32> to vector<64x128xbf16>
    %c0_12 = arith.constant 0 : index
    %c0_13 = arith.constant 0 : index
    %17 = vector.load %arg6[%c0_12, %c0_13] : memref<128x128xbf16, #tpu.memory_space<vmem>>, vector<128x128xbf16>
    %cst_14 = arith.constant dense<0.000000e+00> : vector<64x128xf32>
    %18 = tpu.matmul %16, %17, %cst_14 {dimension_numbers = #tpu.dot_dimension_numbers<[1], [0], [0], [1], [0, 0, 1, 1], [], []>} : vector<64x128xbf16>, vector<128x128xbf16>, vector<64x128xf32> -> vector<64x128xf32>
    %c0_15 = arith.constant 0 : index
    %c0_16 = arith.constant 0 : index
    %19 = vector.load %arg7[%c0_15, %c0_16] : memref<1x128xf32, #tpu.memory_space<vmem>>, vector<1x128xf32>
    %20 = vector.broadcast %19 : vector<1x128xf32> to vector<64x128xf32>
    %21 = arith.addf %18, %20 : vector<64x128xf32>
    %c0_17 = arith.constant 0 : index
    %c0_18 = arith.constant 0 : index
    %22 = vector.load %arg8[%c0_17, %c0_18] : memref<64x128xf32, #tpu.memory_space<vmem>>, vector<64x128xf32>
    tpu.vector_store %arg8[%c0_17, %c0_18], %21 {strides = array<i32>} : memref<64x128xf32, #tpu.memory_space<vmem>>, vector<64x128xf32>,
    return
  }
  func.func @transform_0(%arg0: i32) -> (i32, i32) {
    %c0_i32 = arith.constant 0 : i32
    %c0_i32_0 = arith.constant 0 : i32
    return %arg0, %c0_i32 : i32, i32
  }
  func.func @transform_1(%arg0: i32) -> (i32, i32) {
    %c0_i32 = arith.constant 0 : i32
    %c0_i32_0 = arith.constant 0 : i32
    %c0_i32_1 = arith.constant 0 : i32
    return %c0_i32, %c0_i32_0 : i32, i32
  }
  func.func @transform_2(%arg0: i32) -> (i32, i32) {
    %c0_i32 = arith.constant 0 : i32
    %c0_i32_0 = arith.constant 0 : i32
    %c0_i32_1 = arith.constant 0 : i32
    return %c0_i32, %c0_i32_0 : i32, i32
  }
  func.func @transform_3(%arg0: i32) -> (i32, i32) {
    %c0_i32 = arith.constant 0 : i32
    %c0_i32_0 = arith.constant 0 : i32
    %c0_i32_1 = arith.constant 0 : i32
    return %c0_i32, %c0_i32_0 : i32, i32
  }
  func.func @transform_4(%arg0: i32) -> (i32, i32) {
    %c0_i32 = arith.constant 0 : i32
    %c0_i32_0 = arith.constant 0 : i32
    %c0_i32_1 = arith.constant 0 : i32
    return %c0_i32, %c0_i32_0 : i32, i32
  }
  func.func @transform_5(%arg0: i32) -> (i32, i32) {
    %c0_i32 = arith.constant 0 : i32
    %c0_i32_0 = arith.constant 0 : i32
    %c0_i32_1 = arith.constant 0 : i32
    return %c0_i32, %c0_i32_0 : i32, i32
  }
  func.func @transform_6(%arg0: i32) -> (i32, i32) {
    %c0_i32 = arith.constant 0 : i32
    %c0_i32_0 = arith.constant 0 : i32
    %c0_i32_1 = arith.constant 0 : i32
    return %c0_i32, %c0_i32_0 : i32, i32
  }
  func.func @transform_7(%arg0: i32) -> (i32, i32) {
    %c0_i32 = arith.constant 0 : i32
    %c0_i32_0 = arith.constant 0 : i32
    return %arg0, %c0_i32 : i32, i32
  }
}

</mosaic_0001>

<bundles_post_ra>
// kernel: gvb_adversarial_forward.1
= control target key start
LH: loop header
LB: loop body
LE: loop exit
PB: predicated region body
PF: predicated region fallthrough
CT: control target
= control target key end

     0   :  { %s1061_s24 = smov 0   ;;  %s1169_s0 = inlined_call_operand.vmem [shape: bf16[128,128], index: 0, kind: input, shape index: {}]   ;;  %s1170_s1 = inlined_call_operand.vmem [shape: bf16[128,128], index: 1, kind: input, shape index: {}]   ;;  %s1171_s2 = inlined_call_operand.vmem [shape: f32[1,128], index: 2, kind: input, shape index: {}]   ;;  %s1172_s3 = inlined_call_operand.vmem [shape: bf16[128,128], index: 3, kind: input, shape index: {}]   ;;  %s1173_s4 = inlined_call_operand.vmem [shape: f32[1,128], index: 4, kind: input, shape index: {}]   ;;  %s1174_s5 = inlined_call_operand.vmem [shape: bf16[128,128], index: 5, kind: input, shape index: {}]   ;;  %s1175_s6 = inlined_call_operand.vmem [shape: f32[1,128], index: 6, kind: input, shape index: {}]   ;;  %s1176_s7 = inlined_call_operand.vmem [shape: f32[128,128], index: 7, kind: output, shape index: {}]  }
   0x1 LB: > { %s811_s25 = sadd.s32 4294967295, %s1019_s24   ;;  %p815_p0 = scmp.ge.s32.totalorder %s1019_s24, 1  ;;  %s1019_s24 = sphi %s1061_s24, %s17_s24  }
   0x2   : > { %p238_p1 = scmp.lt.s32.totalorder %s1019_s24, 3 }
   0x4   : > { %p239_p2 = pnand %p815_p0, %p238_p1 }
   0x5   : > { %v985_v0 = vld [vmem:[%s1170_s1] sm:$0xff] (!%p239_p2)   ;;  %s816_s28 = sshll.u32 (!%p239_p2), %s811_s25, 3  ;;  %v986_v1 = vld [vmem:[%s1170_s1 + $0x8] sm:$0xff] (!%p239_p2)   ;;  %v987_v2 = vld [vmem:[%s1170_s1 + $0x10] sm:$0xff] (!%p239_p2)  }
   0x6   : > { %242 = sbr.rel (%p239_p2) target bundleno = 708 (0x2c4), region = 48  ;;  %p271_p3 = scmp.lt.s32.totalorder (!%p239_p2), %s816_s28, 15  ;;  %889 = vmatprep.subr.bf16.mxu0 (!%p239_p2), %v985_v0  ;;  %v988_v3 = vld [vmem:[%s1170_s1 + $0x18] sm:$0xff] (!%p239_p2)   ;;  %v989_v5 = vld [vmem:[%s1170_s1 + $0x20] sm:$0xff] (!%p239_p2)   ;;  %v998_v7 = vld [vmem:[%s1172_s3 + $0x8] sm:$0xff] (!%p239_p2)  }
   0x7   : > { %890 = vmatpush3.bf16.msra.mxu0 (!%p239_p2), %v985_v0  ;;  %v997_v6 = vld [vmem:[%s1172_s3] sm:$0xff] (!%p239_p2)   ;;  %v990_v8 = vld [vmem:[%s1170_s1 + $0x28] sm:$0xff] (!%p239_p2)   ;;  %v999_v9 = vld [vmem:[%s1172_s3 + $0x10] sm:$0xff] (!%p239_p2)  }
   0x8   : > { %891 = vmatprep.subr.bf16.mxu0 (!%p239_p2), %v986_v1  ;;  %913 = vmatprep.subr.bf16.mxu1 (!%p239_p2), %v997_v6  ;;  %v991_v10 = vld [vmem:[%s1170_s1 + $0x30] sm:$0xff] (!%p239_p2)   ;;  %v1000_v11 = vld [vmem:[%s1172_s3 + $0x18] sm:$0xff] (!%p239_p2)   ;;  %v1001_v13 = vld [vmem:[%s1172_s3 + $0x20] sm:$0xff] (!%p239_p2)  }
   0x9   : > { %914 = vmatpush3.bf16.msra.mxu1 (!%p239_p2), %v997_v6  ;;  %v992_v12 = vld [vmem:[%s1170_s1 + $0x38] sm:$0xff] (!%p239_p2)   ;;  %v1002_v14 = vld [vmem:[%s1172_s3 + $0x28] sm:$0xff] (!%p239_p2)   ;;  %v1003_v18 = vld [vmem:[%s1172_s3 + $0x30] sm:$0xff] (!%p239_p2)  }
   0xa   : > { %915 = vmatprep.subr.bf16.mxu1 (!%p239_p2), %v998_v7  ;;  %v1004_v19 = vld [vmem:[%s1172_s3 + $0x38] sm:$0xff] (!%p239_p2)   ;;  %v1005_v20 = vld [vmem:[%s1174_s5] sm:$0xff] (!%p239_p2)   ;;  %v1006_v21 = vld [vmem:[%s1174_s5 + $0x8] sm:$0xff] (!%p239_p2)  }
   0xb   : > { %892 = vmatpush3.bf16.msra.mxu0 (!%p239_p2), %v986_v1  ;;  %v1007_v22 = vld [vmem:[%s1174_s5 + $0x10] sm:$0xff] (!%p239_p2)   ;;  %v1008_v23 = vld [vmem:[%s1174_s5 + $0x18] sm:$0xff] (!%p239_p2)   ;;  %v1009_v24 = vld [vmem:[%s1174_s5 + $0x20] sm:$0xff] (!%p239_p2)  }
   0xc   : > { %893 = vmatprep.subr.bf16.mxu0 (!%p239_p2), %v987_v2  ;;  %v1010_v25 = vld [vmem:[%s1174_s5 + $0x28] sm:$0xff] (!%p239_p2)   ;;  %v820_v26 = vld [vmem:[%s1171_s2] ss:$0 sm:$0xff] (!%p239_p2)  ;;  %v1011_v55 = vld [vmem:[%s1174_s5 + $0x30] sm:$0xff] (!%p239_p2)  }
   0xd   : > { %s1178_s28 = smov (!%p271_p3, %s816_s28), 15  ;;  %916 = vmatpush3.bf16.msra.mxu1 %v998_v7  ;;  %v1012_v56 = vld [vmem:[%s1174_s5 + $0x38] sm:$0xff]   ;;  %v833_v57 = vld [vmem:[%s1173_s4] ss:$0 sm:$0xff] }
   0xe   : > { %s817_s10 = sshll.u32 %s1178_s28, 2  ;;  %917 = vmatprep.subr.bf16.mxu1 %v999_v9  ;;  %s819_s19 = sshll.u32 %s1178_s28, 3 }
   0xf   : > { %s1084_s13 = scalar_lea.vmem %s1169_s0, %s817_s10  ;;  %894 = vmatpush3.bf16.msra.mxu0 %v987_v2 }
  0x10   : > { %v993_v4 = vld [vmem:[%s1084_s13] sm:$0xff]   ;;  %895 = vmatprep.subr.bf16.mxu0 %v988_v3  ;;  %v994_v15 = vld [vmem:[%s1084_s13 + $0x8] sm:$0xff]   ;;  %v995_v16 = vld [vmem:[%s1084_s13 + $0x10] sm:$0xff]  }
  0x11   : > { %905 = vmatprep.mubr.bf16.mxu0 %v993_v4  ;;  %918 = vmatpush3.bf16.msra.mxu1 %v999_v9  ;;  %v996_v17 = vld [vmem:[%s1084_s13 + $0x18] sm:$0xff]   ;;  %s280_s13 = scalar_lea.vmem %s1176_s7, %s819_s19 }
  0x12   : > { %919 = vmatprep.subr.bf16.mxu1 %v1000_v11 }
  0x13   : > { %896 = vmatpush3.bf16.msra.mxu0 %v988_v3 }
  0x14   : > { %897 = vmatprep.subr.bf16.mxu0 %v989_v5 }
  0x15   : > { %920 = vmatpush3.bf16.msra.mxu1 %v1000_v11 }
  0x16   : > { %921 = vmatprep.subr.bf16.mxu1 %v1001_v13 }
  0x17   : > { %898 = vmatpush3.bf16.msra.mxu0 %v989_v5 }
  0x18   : > { %899 = vmatprep.subr.bf16.mxu0 %v990_v8 }
  0x19   : > { %922 = vmatpush3.bf16.msra.mxu1 %v1001_v13 }
  0x1a   : > { %923 = vmatprep.subr.bf16.mxu1 %v1002_v14 }
  0x1b   : > { %900 = vmatpush3.bf16.msra.mxu0 %v990_v8 }
  0x1c   : > { %901 = vmatprep.subr.bf16.mxu0 %v991_v10 }
  0x1d   : > { %924 = vmatpush3.bf16.msra.mxu1 %v1002_v14 }
  0x1e   : > { %925 = vmatprep.subr.bf16.mxu1 %v1003_v18 }
  0x1f   : > { %902 = vmatpush3.bf16.msra.mxu0 %v991_v10 }
  0x20   : > { %903 = vmatprep.subr.bf16.mxu0 %v992_v12 }
  0x21   : > { %926 = vmatpush3.bf16.msra.mxu1 %v1003_v18 }
  0x22   : > { %927 = vmatprep.subr.bf16.mxu1 %v1004_v19 }
  0x23   : > { %904 = vmatpush3.bf16.msra.mxu0 %v992_v12 }
  0x24   : > { %937 = vmatprep.subr.bf16.mxu0 %v1005_v20 }
  0x25   : > { %928 = vmatpush3.bf16.msra.mxu1 %v1004_v19 }
  0x26   : > { %906 = vmatmul.mubr.bf16.vlgmr.msra.gmra.mrb[0].mxu0 %v994_v15  ;;  %961 = vmatprep.subr.bf16.mxu1 %v1005_v20 }
  0x27   : > { %909 = vmatprep.mubr.bf16.mxu0 %v995_v16  ;;  %938 = vmatpush3.bf16.msra.mxu0 %v1005_v20 }
  0x28   : > { %939 = vmatprep.subr.bf16.mxu0 %v1006_v21 }
  0x2b   : > { %940 = vmatpush3.bf16.msra.mxu0 %v1006_v21 }
  0x2c   : > { %941 = vmatprep.subr.bf16.mxu0 %v1007_v22 }
  0x2e   : > { %910 = vmatmul.mubr.bf16.gmra.mrb[4].mxu0 %v996_v17 }
  0x2f   : > { %942 = vmatpush3.bf16.msra.mxu0 %v1007_v22 }
  0x30   : > { %943 = vmatprep.subr.bf16.mxu0 %v1008_v23 }
  0x33   : > { %944 = vmatpush3.bf16.msra.mxu0 %v1008_v23 }
  0x34   : > { %945 = vmatprep.subr.bf16.mxu0 %v1009_v24 }
  0x37   : > { %946 = vmatpush3.bf16.msra.mxu0 %v1009_v24 }
  0x38   : > { %947 = vmatprep.subr.bf16.mxu0 %v1010_v25 }
  0x3b   : > { %948 = vmatpush3.bf16.msra.mxu0 %v1010_v25 }
  0x3c   : > { %949 = vmatprep.subr.bf16.mxu0 %v1011_v55 }
  0x3f   : > { %950 = vmatpush3.bf16.msra.mxu0 %v1011_v55 }
  0x40   : > { %951 = vmatprep.subr.bf16.mxu0 %v1012_v56 }
  0x43   : > { %952 = vmatpush3.bf16.msra.mxu0 %v1012_v56 }
  0xf9   : > { %v907_v27 = vpop.f32.mrb[0].mxu0 }
  0xfa   : > { %v429_v28 = vadd.f32 %v907_v27, %v820_v26  ;;  %v420_v29 = vpop.f32.mrb[1].mxu0 }
  0xfb   : > { %v421_v30 = vadd.f32 %v820_v26, %v420_v29  ;;  %v908_v31 = vpop.f32.mrb[2].mxu0 }
  0xfc   : > { %v432_v32 = vadd.f32 %v908_v31, %v820_v26  ;;  %v423_v33 = vpop.f32.mrb[3].mxu0  ;;  %v453_v35 = vmax.f32 %v429_v28, 0.0 }
  0xfd   : > { %v424_v34 = vadd.f32 %v820_v26, %v423_v33  ;;  %v451_v37 = vmax.f32 %v421_v30, 0.0 }
  0xfe   : > { %v454_v36 = vmax.f32 %v432_v32, 0.0 }
  0xff   : > { %v452_v38 = vmax.f32 %v424_v34, 0.0 }
 0x100   : > { %v460_v39 = vpack.c.bf16 %v454_v36, %v453_v35 }
 0x101   : > { %v911_v40 = vpop.f32.mrb[4].mxu0  ;;  %v459_v41 = vpack.c.bf16 %v452_v38, %v451_v37 }
 0x102   : > { %v445_v42 = vadd.f32 %v911_v40, %v820_v26  ;;  %v436_v43 = vpop.f32.mrb[5].mxu0 }
 0x103   : > { %v437_v44 = vadd.f32 %v820_v26, %v436_v43  ;;  %v912_v45 = vpop.f32.mrb[6].mxu0  ;;  %929 = vmatprep.mubr.bf16.mxu1 %v459_v41 }
 0x104   : > { %v448_v46 = vadd.f32 %v912_v45, %v820_v26  ;;  %v439_v47 = vpop.f32.mrb[7].mxu0  ;;  %930 = vmatmul.mubr.bf16.vlgmr.msra.gmra.mrb[0].mxu1 %v460_v39  ;;  %v457_v49 = vmax.f32 %v445_v42, 0.0 }
 0x105   : > { %v440_v48 = vadd.f32 %v820_v26, %v439_v47  ;;  %969 = vmatpush3.bf16.msra.mxu1 %v1005_v20  ;;  %v455_v51 = vmax.f32 %v437_v44, 0.0 }
 0x106   : > { %v458_v50 = vmax.f32 %v448_v46, 0.0  ;;  %962 = vmatprep.subr.bf16.mxu1 %v1006_v21 }
 0x107   : > { %v456_v52 = vmax.f32 %v440_v48, 0.0 }
 0x108   : > { %v462_v53 = vpack.c.bf16 %v458_v50, %v457_v49 }
 0x109   : > { %v461_v54 = vpack.c.bf16 %v456_v52, %v455_v51  ;;  %970 = vmatpush3.bf16.msra.mxu1 %v1006_v21 }
 0x10a   : > { %963 = vmatprep.subr.bf16.mxu1 %v1007_v22 }
 0x10b   : > { %933 = vmatprep.mubr.bf16.mxu1 %v461_v54 }
 0x10c   : > { %934 = vmatmul.mubr.bf16.gmra.mrb[4].mxu1 %v462_v53 }
 0x10d   : > { %971 = vmatpush3.bf16.msra.mxu1 %v1007_v22  ;;  %v842_v22 = vld [vmem:[%s1175_s6] ss:$0 sm:$0xff] }
 0x10e   : > { %964 = vmatprep.subr.bf16.mxu1 %v1008_v23 }
 0x111   : > { %972 = vmatpush3.bf16.msra.mxu1 %v1008_v23 }
 0x112   : > { %965 = vmatprep.subr.bf16.mxu1 %v1009_v24 }
 0x115   : > { %973 = vmatpush3.bf16.msra.mxu1 %v1009_v24 }
 0x116   : > { %966 = vmatprep.subr.bf16.mxu1 %v1010_v25 }
 0x119   : > { %974 = vmatpush3.bf16.msra.mxu1 %v1010_v25 }
 0x11a   : > { %967 = vmatprep.subr.bf16.mxu1 %v1011_v55 }
 0x11d   : > { %975 = vmatpush3.bf16.msra.mxu1 %v1011_v55 }
 0x11e   : > { %968 = vmatprep.subr.bf16.mxu1 %v1012_v56 }
 0x121   : > { %976 = vmatpush3.bf16.msra.mxu1 %v1012_v56 }
 0x1d7   : > { %v931_v58 = vpop.f32.mrb[0].mxu1 }
 0x1d8   : > { %v577_v59 = vadd.f32 %v931_v58, %v833_v57  ;;  %v568_v60 = vpop.f32.mrb[1].mxu1 }
 0x1d9   : > { %v569_v61 = vadd.f32 %v833_v57, %v568_v60  ;;  %v932_v62 = vpop.f32.mrb[2].mxu1 }
 0x1da   : > { %v580_v63 = vadd.f32 %v932_v62, %v833_v57  ;;  %v571_v0 = vpop.f32.mrb[3].mxu1  ;;  %v601_v2 = vmax.f32 %v577_v59, 0.0 }
 0x1db   : > { %v572_v1 = vadd.f32 %v833_v57, %v571_v0  ;;  %v599_v4 = vmax.f32 %v569_v61, 0.0 }
 0x1dc   : > { %v602_v3 = vmax.f32 %v580_v63, 0.0 }
 0x1dd   : > { %v600_v5 = vmax.f32 %v572_v1, 0.0 }
 0x1de   : > { %v608_v6 = vpack.c.bf16 %v602_v3, %v601_v2 }
 0x1df   : > { %v607_v7 = vpack.c.bf16 %v600_v5, %v599_v4  ;;  %v935_v8 = vpop.f32.mrb[4].mxu1 }
 0x1e0   : > { %v593_v9 = vadd.f32 %v935_v8, %v833_v57  ;;  %v584_v10 = vpop.f32.mrb[5].mxu1 }
 0x1e1   : > { %v585_v11 = vadd.f32 %v833_v57, %v584_v10  ;;  %v936_v12 = vpop.f32.mrb[6].mxu1  ;;  %953 = vmatprep.mubr.bf16.mxu0 %v607_v7 }
 0x1e2   : > { %v596_v13 = vadd.f32 %v936_v12, %v833_v57  ;;  %v587_v14 = vpop.f32.mrb[7].mxu1  ;;  %954 = vmatmul.mubr.bf16.vlgmr.msra.gmra.mrb[8].mxu0 %v608_v6  ;;  %v605_v16 = vmax.f32 %v593_v9, 0.0 }
 0x1e3   : > { %v588_v15 = vadd.f32 %v833_v57, %v587_v14  ;;  %v603_v18 = vmax.f32 %v585_v11, 0.0 }
 0x1e4   : > { %v606_v17 = vmax.f32 %v596_v13, 0.0 }
 0x1e5   : > { %v604_v19 = vmax.f32 %v588_v15, 0.0 }
 0x1e6   : > { %v610_v20 = vpack.c.bf16 %v606_v17, %v605_v16 }
 0x1e7   : > { %v609_v21 = vpack.c.bf16 %v604_v19, %v603_v18 }
 0x1e9   : > { %957 = vmatprep.mubr.bf16.mxu1 %v609_v21 }
 0x1ea   : > { %958 = vmatmul.mubr.bf16.vlgmr.msra.gmra.mrb[8].mxu1 %v610_v20 }
 0x2b5   : > { %v955_v23 = vpop.f32.mrb[8].mxu0 }
 0x2b6   : > { %v725_v24 = vadd.f32 %v955_v23, %v842_v22  ;;  %v716_v25 = vpop.f32.mrb[9].mxu0 }
 0x2b7   : > { %v717_v26 = vadd.f32 %v842_v22, %v716_v25  ;;  %v956_v27 = vpop.f32.mrb[10].mxu0 }
 0x2b8   : > { %749 = vst [vmem:[%s280_s13 + $0x10] sm:$0xff] %v725_v24  ;;  %v728_v28 = vadd.f32 %v956_v27, %v842_v22  ;;  %v719_v29 = vpop.f32.mrb[11].mxu0 }
 0x2b9   : > { %747 = vst [vmem:[%s280_s13] sm:$0xff] %v717_v26  ;;  %v720_v30 = vadd.f32 %v842_v22, %v719_v29 }
 0x2ba   : > { %750 = vst [vmem:[%s280_s13 + $0x18] sm:$0xff] %v728_v28 }
 0x2bb   : > { %748 = vst [vmem:[%s280_s13 + $0x8] sm:$0xff] %v720_v30 }
 0x2bd   : > { %v959_v31 = vpop.f32.mrb[8].mxu1 }
 0x2be   : > { %v741_v32 = vadd.f32 %v959_v31, %v842_v22  ;;  %v732_v33 = vpop.f32.mrb[9].mxu1 }
 0x2bf   : > { %v733_v34 = vadd.f32 %v842_v22, %v732_v33  ;;  %v960_v35 = vpop.f32.mrb[10].mxu1 }
 0x2c0   : > { %753 = vst [vmem:[%s280_s13 + $0x30] sm:$0xff] %v741_v32  ;;  %v744_v36 = vadd.f32 %v960_v35, %v842_v22  ;;  %v735_v37 = vpop.f32.mrb[11].mxu1 }
 0x2c1   : > { %751 = vst [vmem:[%s280_s13 + $0x20] sm:$0xff] %v733_v34  ;;  %v736_v38 = vadd.f32 %v842_v22, %v735_v37 }
 0x2c2   : > { %754 = vst [vmem:[%s280_s13 + $0x38] sm:$0xff] %v744_v36 }
 0x2c3   : > { %752 = vst [vmem:[%s280_s13 + $0x28] sm:$0xff] %v736_v38 }
 0x2c4 PF: > { %s17_s24 = sadd.s32 1, %s1019_s24  }
 0x2c5   : > { %p14_p4 = scmp.ge.s32.totalorder %s17_s24, 4  }
 0x2c7   :  { %16 = sbr.rel (!%p14_p4) target bundleno = 1 (0x1), region = 78 }

</bundles_post_ra>
